<compile_context>
chip_gen: v5e
topology: v5e:2x2
jax: 0.10.0
libtpu: 0.0.40
codegen_flags: <defaults>
</compile_context>

<pallas_src>
import functools

import jax
import jax.numpy as jnp
from jax.experimental import pallas as pl
from jax.experimental.pallas import tpu as pltpu


# ---------------------------------------------------------------------------
# Pallas kernel: out_T tile (O, tn) = W (O, K) @ A_T tile (K, tn) + b (O, 1)
#   * operands arrive in compute dtype (bf16 by default), MXU accumulates f32,
#   * bias add + final cast happen in f32 vregs (v5e has no bf16 VALU).
# ---------------------------------------------------------------------------
def _gemm_bias_t_kernel(w_ref, a_ref, b_ref, o_ref):
    acc = jnp.dot(w_ref[...], a_ref[...], preferred_element_type=jnp.float32)
    o_ref[...] = (acc + b_ref[...]).astype(o_ref.dtype)


def _ceil_to(v, m):
    return -(-v // m) * m


def _pick_m_tile(m, k, itemsize, vmem_budget=8 * 1024 * 1024):
    """Lane-axis (M) tile.

    Large (amortizes ~0.35us/grid-step overhead), capped so the double-buffered
    A_T tile stays inside a conservative VMEM budget (portable to v7x's 64 MiB),
    and chosen so the grid has >= 2 steps when M allows it (feeds both v7x TCs).
    """
    if m <= 128:
        return m                                     # single full-extent block
    cap = (vmem_budget // (2 * k * itemsize)) // 128 * 128
    cap = int(max(128, min(1024, cap)))
    half = _ceil_to(_ceil_to(m, 2) // 2, 128)        # ceil(m/2) rounded to 128
    return min(cap, half)


def fused_patch_gemm(w_flat, a_t, bias, *, out_dtype, compute_dtype=jnp.bfloat16):
    """out_T (O, M) = w_flat (O, K) @ a_t (K, M) + bias[:, None], tiled over M."""
    o, k = w_flat.shape
    k2, m = a_t.shape
    assert k == k2
    itemsize = jnp.dtype(compute_dtype).itemsize
    tn = _pick_m_tile(m, k, itemsize)
    m_pad = pl.cdiv(m, tn) * tn

    a_c = a_t.astype(compute_dtype)
    if m_pad != m:                                   # tail handling: pad + slice
        a_c = jnp.pad(a_c, ((0, 0), (0, m_pad - m)))
    w_c = w_flat.astype(compute_dtype)
    b_c = bias.reshape(o, 1).astype(jnp.float32)

    out = pl.pallas_call(
        _gemm_bias_t_kernel,
        out_shape=jax.ShapeDtypeStruct((o, m_pad), out_dtype),
        grid=(m_pad // tn,),
        in_specs=[
            pl.BlockSpec((o, k), lambda i: (0, 0)),      # weight, resident
            pl.BlockSpec((k, tn), lambda i: (0, i)),     # A_T tile (lanes = patches)
            pl.BlockSpec((o, 1), lambda i: (0, 0)),      # bias, resident
        ],
        out_specs=pl.BlockSpec((o, tn), lambda i: (0, i)),   # lane-dense output
        compiler_params=pltpu.CompilerParams(
            dimension_semantics=("parallel",),
            vmem_limit_bytes=32 * 1024 * 1024,
        ),
    )(w_c, a_c, b_c)
    return out[:, :m] if m_pad != m else out


# ---------------------------------------------------------------------------
# Plain-JAX glue: exact algebraic fold of up(down(.)) into the proj conv.
# ---------------------------------------------------------------------------
def fold_adapter_params(params):
    """Fold the low-rank branch into the 16x16 proj weight/bias (exact)."""
    w_proj, b_proj = params["w_proj"], params["b_proj"]   # (O,C,16,16), (O,)
    w_down, b_down = params["w_down"], params["b_down"]   # (hid,C,4,4), (hid,)
    w_up, b_up = params["w_up"], params["b_up"]           # (O,hid,4,4), (O,)
    o, c = w_proj.shape[0], w_proj.shape[1]
    # W_lr[o, c, 4*i2+i1, 4*j2+j1] = sum_m W_up[o,m,i2,j2] * W_down[m,c,i1,j1]
    w_lr = jnp.einsum("omij,mckl->ocikjl", w_up, w_down).reshape(o, c, 16, 16)
    # down-bias propagated through up, plus up-bias.
    b_lr = b_up + jnp.einsum("omij,m->o", w_up, b_down)
    return w_proj + w_lr, b_proj + b_lr


def low_rank_conv_adapter(x, params, *, compute_dtype=jnp.bfloat16):
    """out = proj(x) + up(down(x)) for NCHW x, as a single fused Pallas GEMM."""
    w_eff, b_eff = fold_adapter_params(params)   # tiny; may also be hoisted/cached
    n, c, h, w = x.shape
    kk = 16
    hp, wp = h // kk, w // kk
    o = w_eff.shape[0]
    # Transposed im2col: A_T (K, M), rows flattened (c, kh, kw), cols (n, ph, pw).
    a_t = (x.reshape(n, c, hp, kk, wp, kk)
             .transpose(1, 3, 5, 0, 2, 4)
             .reshape(c * kk * kk, n * hp * wp))
    w_flat = w_eff.reshape(o, c * kk * kk)
    out_t = fused_patch_gemm(w_flat, a_t, b_eff,
                             out_dtype=x.dtype, compute_dtype=compute_dtype)
    return out_t.reshape(o, n, hp, wp).transpose(1, 0, 2, 3)   # -> NCHW


if __name__ == "__main__":
    key = jax.random.PRNGKey(0)
    N, C_in, H, W = 2, 4, 32, 32
    C_out, hidden = 8, 16

    ks = jax.random.split(key, 7)
    x = jax.random.normal(ks[0], (N, C_in, H, W), jnp.float32)
    params = {
        "w_proj": 0.02 * jax.random.normal(ks[1], (C_out, C_in, 16, 16), jnp.float32),
        "b_proj": 0.02 * jax.random.normal(ks[2], (C_out,), jnp.float32),
        "w_down": 0.02 * jax.random.normal(ks[3], (hidden, C_in, 4, 4), jnp.float32),
        "b_down": 0.02 * jax.random.normal(ks[4], (hidden,), jnp.float32),
        "w_up":   0.02 * jax.random.normal(ks[5], (C_out, hidden, 4, 4), jnp.float32),
        "b_up":   0.02 * jax.random.normal(ks[6], (C_out,), jnp.float32),
    }

    fwd = jax.jit(functools.partial(low_rank_conv_adapter, compute_dtype=jnp.bfloat16))
    out = jax.block_until_ready(fwd(x, params))

    # Reference: three XLA convs in f32 (same semantics as the PyTorch module).
    def ref_conv(xx, w, b, s):
        y = jax.lax.conv_general_dilated(
            xx, w, (s, s), "VALID", dimension_numbers=("NCHW", "OIHW", "NCHW"))
        return y + b[None, :, None, None]

    ref = ref_conv(x, params["w_proj"], params["b_proj"], 16) + ref_conv(
        ref_conv(x, params["w_down"], params["b_down"], 4),
        params["w_up"], params["b_up"], 4)

    assert out.shape == (N, C_out, H // 16, W // 16)
    # bf16 GEMM operands with f32 accumulation -> loosened tolerance vs f32 ref.
    err = float(jnp.max(jnp.abs(out - ref)))
    assert jnp.allclose(out, ref, atol=3e-2, rtol=3e-2), f"max abs err {err}"
    print("KERNEL_OK")
</pallas_src>

<mosaic_0001>
module attributes {stable_mosaic.version = 11 : i64} {
  func.func @_gemm_bias_t_kernel(%arg0: i32, %arg1: memref<8x1024xbf16, #tpu.memory_space<vmem>>, %arg2: memref<1024x8xbf16, #tpu.memory_space<vmem>>, %arg3: memref<8x1xf32, #tpu.memory_space<vmem>>, %arg4: memref<8x8xf32, #tpu.memory_space<vmem>>) attributes {dimension_semantics = [#tpu.dimension_semantics<parallel>], iteration_bounds = array<i64: 1>, scalar_prefetch = 0 : i64, scratch_operands = 0 : i64, tpu.core_type = #tpu.core_type<tc>, window_params = [{pipeline_mode = #tpu.pipeline_mode<synchronous>, transform_indices = @transform_0, window_bounds = array<i64: 8, 1024>}, {transform_indices = @transform_1, window_bounds = array<i64: 1024, 8>}, {pipeline_mode = #tpu.pipeline_mode<synchronous>, transform_indices = @transform_2, window_bounds = array<i64: 8, 1>}, {transform_indices = @transform_3, window_bounds = array<i64: 8, 8>}]} {
    %c0 = arith.constant 0 : index
    %c0_0 = arith.constant 0 : index
    %0 = vector.load %arg1[%c0, %c0_0] : memref<8x1024xbf16, #tpu.memory_space<vmem>>, vector<8x1024xbf16>
    %c0_1 = arith.constant 0 : index
    %c0_2 = arith.constant 0 : index
    %1 = vector.load %arg2[%c0_1, %c0_2] : memref<1024x8xbf16, #tpu.memory_space<vmem>>, vector<1024x8xbf16>
    %cst = arith.constant dense<0.000000e+00> : vector<8x8xf32>
    %2 = tpu.matmul %0, %1, %cst {dimension_numbers = #tpu.dot_dimension_numbers<[1], [0], [0], [1], [0, 0, 1, 1], [], []>} : vector<8x1024xbf16>, vector<1024x8xbf16>, vector<8x8xf32> -> vector<8x8xf32>
    %c0_3 = arith.constant 0 : index
    %c0_4 = arith.constant 0 : index
    %3 = vector.load %arg3[%c0_3, %c0_4] : memref<8x1xf32, #tpu.memory_space<vmem>>, vector<8x1xf32>
    %4 = vector.broadcast %3 : vector<8x1xf32> to vector<8x8xf32>
    %5 = arith.addf %2, %4 : vector<8x8xf32>
    %c0_5 = arith.constant 0 : index
    %c0_6 = arith.constant 0 : index
    %6 = vector.load %arg4[%c0_5, %c0_6] : memref<8x8xf32, #tpu.memory_space<vmem>>, vector<8x8xf32>
    tpu.vector_store %arg4[%c0_5, %c0_6], %5 {strides = array<i32>} : memref<8x8xf32, #tpu.memory_space<vmem>>, vector<8x8xf32>,
    return
  }
  func.func @transform_0(%arg0: i32) -> (i32, i32) {
    %c0_i32 = arith.constant 0 : i32
    %c0_i32_0 = arith.constant 0 : i32
    %c0_i32_1 = arith.constant 0 : i32
    return %c0_i32, %c0_i32_0 : i32, i32
  }
  func.func @transform_1(%arg0: i32) -> (i32, i32) {
    %c0_i32 = arith.constant 0 : i32
    %c0_i32_0 = arith.constant 0 : i32
    return %c0_i32, %arg0 : i32, i32
  }
  func.func @transform_2(%arg0: i32) -> (i32, i32) {
    %c0_i32 = arith.constant 0 : i32
    %c0_i32_0 = arith.constant 0 : i32
    %c0_i32_1 = arith.constant 0 : i32
    return %c0_i32, %c0_i32_0 : i32, i32
  }
  func.func @transform_3(%arg0: i32) -> (i32, i32) {
    %c0_i32 = arith.constant 0 : i32
    %c0_i32_0 = arith.constant 0 : i32
    return %c0_i32, %arg0 : i32, i32
  }
}

</mosaic_0001>

<bundles_post_ra>
// kernel: low_rank_conv_adapter.1
= control target key start
LH: loop header
LB: loop body
LE: loop exit
PB: predicated region body
PF: predicated region fallthrough
CT: control target
= control target key end

     0   :  { %v996_v41 = vmov 0   ;;  %vm668_vm0 = vcmask 64512   ;;  %s1227_s1 = inlined_call_operand.vmem [shape: bf16[1024,8], index: 1, kind: input, shape index: {}]   ;;  %s1228_s0 = inlined_call_operand.vmem [shape: bf16[8,1024], index: 0, kind: input, shape index: {}]   ;;  %s1229_s2 = inlined_call_operand.vmem [shape: f32[8,1], index: 2, kind: input, shape index: {}]   ;;  %s1230_s3 = inlined_call_operand.vmem [shape: f32[8,8], index: 3, kind: output, shape index: {}]  }
   0x1   :  { %v937_v0 = vld [vmem:[%s1227_s1 + $0x38] sm:$0xff]  ;;  %v936_v4 = vld [vmem:[%s1227_s1 + $0x30] sm:$0xff]  ;;  %v935_v8 = vld [vmem:[%s1227_s1 + $0x28] sm:$0xff]  ;;  %995 = vset.pattern.permute.xlu0 %v996_v41 }
   0x2   :  { %v945_v1 = vld [vmem:[%s1227_s1 + $0x78] sm:$0xff]  ;;  %564 = vmatpush.bf16.msra.mxu0 %v937_v0  ;;  %v944_v5 = vld [vmem:[%s1227_s1 + $0x70] sm:$0xff]  ;;  %v943_v9 = vld [vmem:[%s1227_s1 + $0x68] sm:$0xff] }
   0x3   :  { %v953_v2 = vld [vmem:[%s1227_s1 + $0xb8] sm:$0xff]  ;;  %577 = vmatpush.bf16.msra.mxu1 %v945_v1  ;;  %v952_v6 = vld [vmem:[%s1227_s1 + $0xb0] sm:$0xff]  ;;  %v951_v10 = vld [vmem:[%s1227_s1 + $0xa8] sm:$0xff] }
   0x4   :  { %v961_v3 = vld [vmem:[%s1227_s1 + $0xf8] sm:$0xff]  ;;  %590 = vmatpush.bf16.msra.mxu2 %v953_v2  ;;  %v960_v7 = vld [vmem:[%s1227_s1 + $0xf0] sm:$0xff]  ;;  %v959_v11 = vld [vmem:[%s1227_s1 + $0xe8] sm:$0xff] }
   0x5   :  { %603 = vmatpush.bf16.msra.mxu3 %v961_v3  ;;  %v934_v12 = vld [vmem:[%s1227_s1 + $0x20] sm:$0xff]  ;;  %v933_v16 = vld [vmem:[%s1227_s1 + $0x18] sm:$0xff]  ;;  %v932_v20 = vld [vmem:[%s1227_s1 + $0x10] sm:$0xff] }
   0x6   :  { %565 = vmatpush.bf16.msra.mxu0 %v936_v4  ;;  %v942_v13 = vld [vmem:[%s1227_s1 + $0x60] sm:$0xff]  ;;  %v941_v17 = vld [vmem:[%s1227_s1 + $0x58] sm:$0xff]  ;;  %v940_v21 = vld [vmem:[%s1227_s1 + $0x50] sm:$0xff] }
   0x7   :  { %578 = vmatpush.bf16.msra.mxu1 %v944_v5  ;;  %v950_v14 = vld [vmem:[%s1227_s1 + $0xa0] sm:$0xff]  ;;  %v949_v18 = vld [vmem:[%s1227_s1 + $0x98] sm:$0xff]  ;;  %v948_v22 = vld [vmem:[%s1227_s1 + $0x90] sm:$0xff] }
   0x8   :  { %591 = vmatpush.bf16.msra.mxu2 %v952_v6  ;;  %v958_v15 = vld [vmem:[%s1227_s1 + $0xe0] sm:$0xff]  ;;  %v957_v19 = vld [vmem:[%s1227_s1 + $0xd8] sm:$0xff]  ;;  %v956_v23 = vld [vmem:[%s1227_s1 + $0xd0] sm:$0xff] }
   0x9   :  { %604 = vmatpush.bf16.msra.mxu3 %v960_v7  ;;  %v931_v24 = vld [vmem:[%s1227_s1 + $0x8] sm:$0xff]  ;;  %v14_v29 = vld [vmem:[%s1228_s0] sm:$0xff]  ;;  %v969_v39 = vld [vmem:[%s1227_s1 + $0x138] sm:$0xff] }
   0xa   :  { %566 = vmatpush.bf16.msra.mxu0 %v935_v8  ;;  %v939_v25 = vld [vmem:[%s1227_s1 + $0x48] sm:$0xff]  ;;  %v930_v30 = vld [vmem:[%s1227_s1] sm:$0xff]  ;;  %v156_v37 = vunpack.c.l.b16 %v14_v29  ;;  %v157_v38 = vunpack.c.h.b16 %v14_v29  ;;  %v977_v40 = vld [vmem:[%s1227_s1 + $0x178] sm:$0xff] }
   0xb   :  { %579 = vmatpush.bf16.msra.mxu1 %v943_v9  ;;  %v947_v26 = vld [vmem:[%s1227_s1 + $0x88] sm:$0xff]  ;;  %v938_v31 = vld [vmem:[%s1227_s1 + $0x40] sm:$0xff]  ;;  %v985_v42 = vld [vmem:[%s1227_s1 + $0x1b8] sm:$0xff] }
   0xc   :  { %592 = vmatpush.bf16.msra.mxu2 %v951_v10  ;;  %v955_v27 = vld [vmem:[%s1227_s1 + $0xc8] sm:$0xff]  ;;  %v146_v34 = vld [vmem:[%s1229_s2] sm:$0xff]  ;;  %v993_v43 = vld [vmem:[%s1227_s1 + $0x1f8] sm:$0xff]  ;;  %v164_v46 = vpack.c.b16 %v156_v37, %v156_v37  ;;  %v165_v47 = vpack.c.b16 %v157_v38, %v157_v38 }
   0xd   :  { %605 = vmatpush.bf16.msra.mxu3 %v959_v11  ;;  %v15_v28 = vld [vmem:[%s1228_s0 + $0x8] sm:$0xff]  ;;  %v946_v35 = vld [vmem:[%s1227_s1 + $0x80] sm:$0xff]  ;;  %149 = vperm.xlu0 %995, %v146_v34   ;;  %v968_v48 = vld [vmem:[%s1227_s1 + $0x130] sm:$0xff] }
   0xe   :  { %567 = vmatpush.bf16.msra.mxu0 %v934_v12  ;;  %v158_v32 = vunpack.c.l.b16 %v15_v28  ;;  %v159_v33 = vunpack.c.h.b16 %v15_v28  ;;  %v954_v36 = vld [vmem:[%s1227_s1 + $0xc0] sm:$0xff]  ;;  %v976_v49 = vld [vmem:[%s1227_s1 + $0x170] sm:$0xff]  ;;  %v967_v52 = vld [vmem:[%s1227_s1 + $0x128] sm:$0xff] }
   0xf   :  { %580 = vmatpush.bf16.msra.mxu1 %v942_v13  ;;  %v984_v50 = vld [vmem:[%s1227_s1 + $0x1b0] sm:$0xff]  ;;  %v975_v53 = vld [vmem:[%s1227_s1 + $0x168] sm:$0xff]  ;;  %v966_v56 = vld [vmem:[%s1227_s1 + $0x120] sm:$0xff] }
  0x10   :  { %593 = vmatpush.bf16.msra.mxu2 %v950_v14  ;;  %v166_v44 = vpack.c.b16 %v158_v32, %v158_v32  ;;  %v167_v45 = vpack.c.b16 %v159_v33, %v159_v33  ;;  %v992_v51 = vld [vmem:[%s1227_s1 + $0x1f0] sm:$0xff]  ;;  %v983_v54 = vld [vmem:[%s1227_s1 + $0x1a8] sm:$0xff]  ;;  %v974_v57 = vld [vmem:[%s1227_s1 + $0x160] sm:$0xff] }
  0x11   :  { %606 = vmatpush.bf16.msra.mxu3 %v958_v15  ;;  %v991_v55 = vld [vmem:[%s1227_s1 + $0x1e8] sm:$0xff]  ;;  %v982_v58 = vld [vmem:[%s1227_s1 + $0x1a0] sm:$0xff]  ;;  %v965_v60 = vld [vmem:[%s1227_s1 + $0x118] sm:$0xff] }
  0x12   :  { %568 = vmatpush.bf16.msra.mxu0 %v933_v16  ;;  %v990_v59 = vld [vmem:[%s1227_s1 + $0x1e0] sm:$0xff]  ;;  %v973_v61 = vld [vmem:[%s1227_s1 + $0x158] sm:$0xff]  ;;  %v964_v0 = vld [vmem:[%s1227_s1 + $0x110] sm:$0xff] }
  0x13   :  { %581 = vmatpush.bf16.msra.mxu1 %v941_v17  ;;  %v981_v62 = vld [vmem:[%s1227_s1 + $0x198] sm:$0xff]  ;;  %v972_v1 = vld [vmem:[%s1227_s1 + $0x150] sm:$0xff]  ;;  %v963_v4 = vld [vmem:[%s1227_s1 + $0x108] sm:$0xff] }
  0x14   :  { %594 = vmatpush.bf16.msra.mxu2 %v949_v18  ;;  %v989_v63 = vld [vmem:[%s1227_s1 + $0x1d8] sm:$0xff]  ;;  %v980_v2 = vld [vmem:[%s1227_s1 + $0x190] sm:$0xff]  ;;  %v971_v5 = vld [vmem:[%s1227_s1 + $0x148] sm:$0xff] }
  0x15   :  { %607 = vmatpush.bf16.msra.mxu3 %v957_v19  ;;  %v988_v3 = vld [vmem:[%s1227_s1 + $0x1d0] sm:$0xff]  ;;  %v979_v7 = vld [vmem:[%s1227_s1 + $0x188] sm:$0xff]  ;;  %v17_v9 = vld [vmem:[%s1228_s0 + $0x18] sm:$0xff] }
  0x16   :  { %569 = vmatpush.bf16.msra.mxu0 %v932_v20  ;;  %v16_v6 = vld [vmem:[%s1228_s0 + $0x10] sm:$0xff]  ;;  %v987_v8 = vld [vmem:[%s1227_s1 + $0x1c8] sm:$0xff]  ;;  %v962_v12 = vld [vmem:[%s1227_s1 + $0x100] sm:$0xff]  ;;  %v162_v14 = vunpack.c.l.b16 %v17_v9  ;;  %v163_v15 = vunpack.c.h.b16 %v17_v9 }
  0x17   :  { %582 = vmatpush.bf16.msra.mxu1 %v940_v21  ;;  %v160_v10 = vunpack.c.l.b16 %v16_v6  ;;  %v161_v11 = vunpack.c.h.b16 %v16_v6  ;;  %v970_v13 = vld [vmem:[%s1227_s1 + $0x140] sm:$0xff] }
  0x18   :  { %595 = vmatpush.bf16.msra.mxu2 %v948_v22  ;;  %v978_v16 = vld [vmem:[%s1227_s1 + $0x180] sm:$0xff]  ;;  %v170_v20 = vpack.c.b16 %v162_v14, %v162_v14  ;;  %v171_v21 = vpack.c.b16 %v163_v15, %v163_v15 }
  0x19   :  { %608 = vmatpush.bf16.msra.mxu3 %v956_v23  ;;  %v986_v17 = vld [vmem:[%s1227_s1 + $0x1c0] sm:$0xff]  ;;  %v168_v18 = vpack.c.b16 %v160_v10, %v160_v10  ;;  %v169_v19 = vpack.c.b16 %v161_v11, %v161_v11 }
  0x1a   :  { %570 = vmatpush.bf16.msra.mxu0 %v931_v24 }
  0x1b   :  { %583 = vmatpush.bf16.msra.mxu1 %v939_v25 }
  0x1c   :  { %596 = vmatpush.bf16.msra.mxu2 %v947_v26 }
  0x1d   :  { %609 = vmatpush.bf16.msra.mxu3 %v955_v27 }
  0x1e   :  { %571 = vmatpush.bf16.msra.mxu0 %v930_v30 }
  0x1f   :  { %584 = vmatpush.bf16.msra.mxu1 %v938_v31 }
  0x20   :  { %597 = vmatpush.bf16.msra.mxu2 %v946_v35 }
  0x21   :  { %610 = vmatpush.bf16.msra.mxu3 %v954_v36  ;;  %572 = vmatmul.bf16.vlgmr.msra.gmra.mxu0 %v164_v46 }
  0x22   :  { %616 = vmatpush.bf16.msrb.mxu0 %v969_v39  ;;  %585 = vmatmul.bf16.vlgmr.msra.gmra.mxu1 %v165_v47 }
  0x23   :  { %629 = vmatpush.bf16.msrb.mxu1 %v977_v40  ;;  %598 = vmatmul.bf16.vlgmr.msra.gmra.mxu2 %v166_v44 }
  0x24   :  { %642 = vmatpush.bf16.msrb.mxu2 %v985_v42  ;;  %611 = vmatmul.bf16.vlgmr.msra.gmra.mxu3 %v167_v45 }
  0x25   :  { %655 = vmatpush.bf16.msrb.mxu3 %v993_v43 }
  0x26   :  { %617 = vmatpush.bf16.msrb.mxu0 %v968_v48 }
  0x27   :  { %630 = vmatpush.bf16.msrb.mxu1 %v976_v49 }
  0x28   :  { %643 = vmatpush.bf16.msrb.mxu2 %v984_v50 }
  0x29   :  { %656 = vmatpush.bf16.msrb.mxu3 %v992_v51 }
  0x2a   :  { %618 = vmatpush.bf16.msrb.mxu0 %v967_v52 }
  0x2b   :  { %631 = vmatpush.bf16.msrb.mxu1 %v975_v53 }
  0x2c   :  { %644 = vmatpush.bf16.msrb.mxu2 %v983_v54 }
  0x2d   :  { %657 = vmatpush.bf16.msrb.mxu3 %v991_v55 }
  0x2e   :  { %619 = vmatpush.bf16.msrb.mxu0 %v966_v56 }
  0x2f   :  { %632 = vmatpush.bf16.msrb.mxu1 %v974_v57 }
  0x30   :  { %645 = vmatpush.bf16.msrb.mxu2 %v982_v58 }
  0x31   :  { %658 = vmatpush.bf16.msrb.mxu3 %v990_v59 }
  0x32   :  { %620 = vmatpush.bf16.msrb.mxu0 %v965_v60 }
  0x33   :  { %633 = vmatpush.bf16.msrb.mxu1 %v973_v61 }
  0x34   :  { %646 = vmatpush.bf16.msrb.mxu2 %v981_v62 }
  0x35   :  { %659 = vmatpush.bf16.msrb.mxu3 %v989_v63 }
  0x36   :  { %621 = vmatpush.bf16.msrb.mxu0 %v964_v0 }
  0x37   :  { %634 = vmatpush.bf16.msrb.mxu1 %v972_v1 }
  0x38   :  { %647 = vmatpush.bf16.msrb.mxu2 %v980_v2 }
  0x39   :  { %660 = vmatpush.bf16.msrb.mxu3 %v988_v3 }
  0x3a   :  { %622 = vmatpush.bf16.msrb.mxu0 %v963_v4 }
  0x3b   :  { %635 = vmatpush.bf16.msrb.mxu1 %v971_v5 }
  0x3c   :  { %648 = vmatpush.bf16.msrb.mxu2 %v979_v7 }
  0x3d   :  { %661 = vmatpush.bf16.msrb.mxu3 %v987_v8 }
  0x3e   :  { %623 = vmatpush.bf16.msrb.mxu0 %v962_v12 }
  0x3f   :  { %636 = vmatpush.bf16.msrb.mxu1 %v970_v13 }
  0x40   :  { %649 = vmatpush.bf16.msrb.mxu2 %v978_v16 }
  0x41   :  { %662 = vmatpush.bf16.msrb.mxu3 %v986_v17  ;;  %624 = vmatmul.bf16.vlgmr.msrb.gmra.mxu0 %v168_v18 }
  0x42   :  { %637 = vmatmul.bf16.vlgmr.msrb.gmra.mxu1 %v169_v19 }
  0x43   :  { %650 = vmatmul.bf16.vlgmr.msrb.gmra.mxu2 %v170_v20 }
  0x44   :  { %663 = vmatmul.bf16.vlgmr.msrb.gmra.mxu3 %v171_v21 }
  0x7f   :  { %v150_v28 = vpop.permute.xlu0 %149 }
  0x9e   :  { %v573_v22 = vpop.f32.mrf.mxu0 }
  0x9f   :  { %v586_v23 = vpop.f32.mrf.mxu1  ;;  %v574_v31 = vadd.f32 %v573_v22, %v150_v28 }
  0xa1   :  { %v587_v32 = vadd.f32 %v586_v23, %v574_v31 }
  0xa6   :  { %v599_v24 = vpop.f32.mrf.mxu2  ;;  %v575_v26 = vpop.f32.mrf.mxu0 }
  0xa7   :  { %v612_v25 = vpop.f32.mrf.mxu3  ;;  %v588_v27 = vpop.f32.mrf.mxu1  ;;  %v600_v33 = vadd.f32 %v599_v24, %v587_v32 }
  0xa9   :  { %v613_v34 = vadd.f32 %v612_v25, %v600_v33 }
  0xae   :  { %v601_v29 = vpop.f32.mrf.mxu2 }
  0xaf   :  { %v614_v30 = vpop.f32.mrf.mxu3 }
  0xbe   :  { %v625_v35 = vpop.f32.mrf.mxu0 }
  0xbf   :  { %v638_v36 = vpop.f32.mrf.mxu1  ;;  %v626_v37 = vadd.f32 %v625_v35, %v613_v34 }
  0xc1   :  { %v639_v38 = vadd.f32 %v638_v36, %v626_v37 }
  0xc6   :  { %v651_v39 = vpop.f32.mrf.mxu2  ;;  %v627_v42 = vpop.f32.mrf.mxu0 }
  0xc7   :  { %v664_v40 = vpop.f32.mrf.mxu3  ;;  %v652_v41 = vadd.f32 %v651_v39, %v639_v38  ;;  %v640_v43 = vpop.f32.mrf.mxu1 }
  0xc9   :  { %v665_v44 = vadd.f32 %v664_v40, %v652_v41 }
  0xcb   :  { %669 = vst.msk [vmem:[%s1230_s3] sm:$0xff] %vm668_vm0, %v665_v44 }
  0xce   :  { %v653_v45 = vpop.f32.mrf.mxu2 }
  0xcf   :  { %v666_v46 = vpop.f32.mrf.mxu3 }

</bundles_post_ra>
